<compile_context>
chip_gen: v7x
topology: tpu7x:2x2x1
jax: 0.10.0
libtpu: 0.0.40
codegen_flags: <defaults>
</compile_context>

<pallas_src>
import functools

import jax
import jax.numpy as jnp
from jax import lax
from jax.experimental import pallas as pl
from jax.experimental.pallas import tpu as pltpu


def _focal_loss_kernel(x_ref, t_ref, psum_ref, pcnt_ref, *,
                       gamma, ignore_index, n_rows, n_classes, fold, tile_rows):
    """One folded tile: x_ref [tile, fold*C] (lane-dense), t_ref [tile, fold] int32.

    Folded row r, sub-row j holds original row (chunk_start + r)*fold + j in lanes
    [j*C, (j+1)*C).  Emits one per-chunk partial (sum, count) block.
    """
    i = pl.program_id(0)
    c = n_classes
    t_all = t_ref[...]                                          # [tile, fold]
    tile = t_all.shape[0]

    # Original-row index of sub-row j is base_row + j.
    r = lax.broadcasted_iota(jnp.int32, (tile, 1), 0)
    base_row = (i * tile_rows + r) * fold                       # [tile, 1]

    col = lax.broadcasted_iota(jnp.int32, (tile, c), 1)         # class index within a sub-row

    loss_acc = jnp.zeros((tile, 1), jnp.float32)
    cnt_acc = jnp.zeros((tile, 1), jnp.float32)

    g = float(gamma)
    int_gamma = (g == int(g)) and (0 <= int(g) <= 16)

    for j in range(fold):
        # Static lane window holding one original-row group; upcast to f32 in-kernel so bf16
        # inputs keep their halved HBM traffic.
        x = x_ref[:, j * c:(j + 1) * c].astype(jnp.float32)     # [tile, C]
        t = t_all[:, j:j + 1]                                   # [tile, 1]

        # Numerically stable log-softmax pieces; only the target column of logpt is needed.
        # Full-width work: one max-reduce, one exp (single EUP pass; NOTE v7x: if a bundle
        # dump shows the EUP slot saturated with bf16 inputs, this exp is the place to
        # evaluate a bf16 exp with f32 accumulation), one sum-reduce, one one-hot gather.
        m = jnp.max(x, axis=1, keepdims=True)                            # [tile, 1]
        sumexp = jnp.sum(jnp.exp(x - m), axis=1, keepdims=True)          # [tile, 1]
        lse = jnp.log(sumexp)

        # Gather x (not z = x - m): z then has a single consumer (the exp) and no second
        # full-width f32 temporary has to stay live.
        x_t = jnp.sum(jnp.where(col == t, x, 0.0), axis=1, keepdims=True)
        logpt_t = (x_t - m) - lse                                        # [tile, 1]
        pt_t = jnp.exp(logpt_t)                                          # per-row exp only
        one_minus = 1.0 - pt_t

        if int_gamma:
            # Integer gamma (default 2): repeated multiply on the VPU, no EUP pow.
            mod = jnp.ones_like(one_minus)
            for _ in range(int(g)):
                mod = mod * one_minus
        else:
            # General gamma: pow = exp(g*log(x)); clamp to avoid pow(0, g) NaN lowering.
            mod = jnp.exp(g * jnp.log(jnp.maximum(one_minus, jnp.float32(1e-30))))
        fl_t = mod * logpt_t                                             # [tile, 1]

        # Mask ignore_index rows, wrapper pad rows, and OOB tail-block rows (where is a
        # lane select, so NaN/Inf in padded/garbage rows stays confined).
        valid = (t != ignore_index) & ((base_row + j) < n_rows)
        loss_acc = loss_acc + jnp.where(valid, -fl_t, 0.0)
        cnt_acc = cnt_acc + valid.astype(jnp.float32)

    # Per-chunk partials in an (8,128)-aligned block; wrapper reads [:, 0, 0] and reduces.
    psum_ref[...] = jnp.broadcast_to(jnp.sum(loss_acc), psum_ref.shape)
    pcnt_ref[...] = jnp.broadcast_to(jnp.sum(cnt_acc), pcnt_ref.shape)


def _vmem_budget():
    """(scoped-vmem limit, bytes to spend on the pipelined tile) for this TPU generation."""
    try:
        phys = int(pltpu.get_tpu_info().vmem_capacity_bytes)
    except Exception:
        phys = 64 * 1024 * 1024                     # assume the smallest (v7x per-TC) if query fails
    vmem_limit = min(phys // 2, 64 * 1024 * 1024)   # ~64 MiB on v5e/v6e, ~32 MiB on v7x
    return vmem_limit, int(vmem_limit * 0.6)        # headroom for outputs / pipeline state


def _choose_tile_rows(rows, row_bytes, budget_bytes):
    """Largest sublane-aligned tile that fits the budget, capped so >= 2 chunks exist."""
    tile = max(8, (budget_bytes // max(1, row_bytes)) // 8 * 8)
    # Keep at least two chunks when possible so both v7x TensorCores get work.
    half = -(-rows // 2)
    half = -(-half // 8) * 8
    tile = min(tile, max(8, half))
    if tile >= rows:
        return rows                                 # single block covering the full row dim
    return tile


def focal_loss(logits, targets, *, gamma=2, ignore_index=-100, tile_rows=None):
    """logits: [N, C] float (f32 or bf16), targets: [N] int.  Returns scalar f32 loss."""
    n, c = logits.shape
    t = targets.astype(jnp.int32)

    # Lane-density fold: pack `fold` consecutive rows into one folded row of width fold*C so
    # the logits block's last dim is 128-lane dense (e.g. C=32 f32: 512 B dense rows instead
    # of 128 B rows padded to 512 B in VMEM).  Free bitcast for a contiguous [N, C] input.
    if c < 128 and 128 % c == 0:
        fold = min(128 // c, 16)
    else:
        fold = 1                 # e.g. C=48: fall back to the per-row (lane-sparse) layout
    n_pad = ((n + fold - 1) // fold) * fold
    x = logits
    if n_pad != n:
        # NOTE: this pad copies the array; feed N % fold == 0 for peak performance.
        x = jnp.pad(x, ((0, n_pad - n), (0, 0)))
        t = jnp.pad(t, ((0, n_pad - n),), constant_values=ignore_index)
    rows = n_pad // fold
    width = fold * c
    xf = x.reshape(rows, width)
    tf = t.reshape(rows, fold)

    # Per-folded-row VMEM cost: double-buffered logits, double-buffered (tile, fold) int32
    # targets padded to 128 lanes (512 B/row), and ~4 full-width f32 intermediates (upcast
    # tile, exp, one-hot/compare masks) -- budgeted in f32 even for bf16 HBM inputs.
    vmem_limit, tile_budget = _vmem_budget()
    row_bytes = 2 * width * logits.dtype.itemsize + 2 * 512 + 4 * width * 4

    if tile_rows is None:
        tile = _choose_tile_rows(rows, row_bytes, tile_budget)
    else:
        tile = min(int(tile_rows), rows)
        if tile < rows:
            tile = max(8, (tile // 8) * 8)
    num_chunks = pl.cdiv(rows, tile)

    kernel = functools.partial(
        _focal_loss_kernel, gamma=gamma, ignore_index=ignore_index,
        n_rows=n, n_classes=c, fold=fold, tile_rows=tile)

    psum, pcnt = pl.pallas_call(
        kernel,
        out_shape=(
            jax.ShapeDtypeStruct((num_chunks, 8, 128), jnp.float32),
            jax.ShapeDtypeStruct((num_chunks, 8, 128), jnp.float32),
        ),
        grid_spec=pltpu.PrefetchScalarGridSpec(
            num_scalar_prefetch=0,
            grid=(num_chunks,),
            in_specs=[
                pl.BlockSpec((tile, width), lambda i: (i, 0)),   # lane-dense logits tile
                pl.BlockSpec((tile, fold), lambda i: (i, 0)),    # folded int32 targets
            ],
            out_specs=[
                pl.BlockSpec((1, 8, 128), lambda i: (i, 0, 0)),
                pl.BlockSpec((1, 8, 128), lambda i: (i, 0, 0)),
            ],
            # Default double buffering kept on purpose (kernel is DMA bound).
        ),
        compiler_params=pltpu.CompilerParams(
            dimension_semantics=("parallel",),       # independent chunks -> both v7x TCs
            vmem_limit_bytes=vmem_limit,
        ),
    )(xf, tf)

    # nll_loss mean reduction: sum of -focal_logpt[target] over valid rows / #valid rows.
    # (NaN if every row is ignore_index, matching PyTorch's mean-over-empty behaviour.)
    return jnp.sum(psum[:, 0, 0]) / jnp.sum(pcnt[:, 0, 0])


def focal_loss_ref(logits, targets, *, gamma=2, ignore_index=-100):
    """Pure-JAX reference mirroring the PyTorch module (weight=None)."""
    x = logits.astype(jnp.float32)
    logpt = jax.nn.log_softmax(x, axis=1)
    pt = jnp.exp(logpt)
    fl = ((1.0 - pt) ** gamma) * logpt
    t = targets.astype(jnp.int32)
    valid = t != ignore_index
    safe_t = jnp.where(valid, t, 0)
    picked = jnp.take_along_axis(fl, safe_t[:, None], axis=1)[:, 0]
    num = jnp.sum(jnp.where(valid, -picked, 0.0))
    den = jnp.sum(valid.astype(jnp.float32))
    return num / den


if __name__ == "__main__":
    key = jax.random.PRNGKey(0)
    k1, k2, k3, k4, k5, k6 = jax.random.split(key, 6)

    # Case 1: f32, C=32 -> lane-dense folded path (fold=4), N not a multiple of the fold,
    # single chunk, ignore_index rows present.
    N1, C1 = 22, 32
    x1 = jax.random.normal(k1, (N1, C1), dtype=jnp.float32)
    t1 = jax.random.randint(k2, (N1,), 0, C1, dtype=jnp.int32)
    t1 = t1.at[3].set(-100).at[11].set(-100)
    out1 = jax.block_until_ready(focal_loss(x1, t1, gamma=2, ignore_index=-100))
    ref1 = focal_loss_ref(x1, t1, gamma=2, ignore_index=-100)
    assert jnp.allclose(out1, ref1, rtol=1e-5, atol=1e-5), (out1, ref1)

    # Case 2: f32, C=32, forced small tile -> 3 chunks, OOB tail block + wrapper pad rows.
    N2, C2 = 70, 32
    x2 = jax.random.normal(k3, (N2, C2), dtype=jnp.float32)
    t2 = jax.random.randint(k4, (N2,), 0, C2, dtype=jnp.int32)
    t2 = t2.at[0].set(-100).at[69].set(-100)
    out2 = jax.block_until_ready(focal_loss(x2, t2, gamma=2, ignore_index=-100, tile_rows=8))
    ref2 = focal_loss_ref(x2, t2, gamma=2, ignore_index=-100)
    assert jnp.allclose(out2, ref2, rtol=1e-5, atol=1e-5), (out2, ref2)

    # Case 3: bf16, C=48 (128 % 48 != 0) -> per-row fallback path, 2 chunks, tail masking.
    N3, C3 = 20, 48
    x3 = jax.random.normal(k5, (N3, C3), dtype=jnp.bfloat16)
    t3 = jax.random.randint(k6, (N3,), 0, C3, dtype=jnp.int32)
    t3 = t3.at[0].set(-100)
    out3 = jax.block_until_ready(focal_loss(x3, t3, gamma=2, ignore_index=-100, tile_rows=16))
    ref3 = focal_loss_ref(x3, t3, gamma=2, ignore_index=-100)
    assert jnp.allclose(out3, ref3, rtol=1e-4, atol=1e-4), (out3, ref3)

    # Case 4: non-integer gamma (exercises the clamped pow path).
    out4 = jax.block_until_ready(focal_loss(x1, t1, gamma=1.5, ignore_index=-100))
    ref4 = focal_loss_ref(x1, t1, gamma=1.5, ignore_index=-100)
    assert jnp.allclose(out4, ref4, rtol=1e-5, atol=1e-5), (out4, ref4)

    print("KERNEL_OK")
</pallas_src>

<mosaic_0001>
module attributes {stable_mosaic.version = 11 : i64} {
  func.func @_focal_loss_kernel(%arg0: i32, %arg1: memref<6x128xf32, #tpu.memory_space<vmem>>, %arg2: memref<6x4xi32, #tpu.memory_space<vmem>>, %arg3: memref<1x8x128xf32, #tpu.memory_space<vmem>>, %arg4: memref<1x8x128xf32, #tpu.memory_space<vmem>>) attributes {dimension_semantics = [#tpu.dimension_semantics<parallel>], iteration_bounds = array<i64: 1>, scalar_prefetch = 0 : i64, scratch_operands = 0 : i64, tpu.core_type = #tpu.core_type<tc>, window_params = [{transform_indices = @transform_0, window_bounds = array<i64: 6, 128>}, {transform_indices = @transform_1, window_bounds = array<i64: 6, 4>}, {transform_indices = @transform_2, window_bounds = array<i64: 1, 8, 128>}, {transform_indices = @transform_3, window_bounds = array<i64: 1, 8, 128>}]} {
    %c0 = arith.constant 0 : index
    %c0_0 = arith.constant 0 : index
    %0 = vector.load %arg2[%c0, %c0_0] : memref<6x4xi32, #tpu.memory_space<vmem>>, vector<6x4xi32>
    %1 = tpu.iota {dimensions = array<i32: 0>} : vector<6x1xi32>
    %c6_i32 = arith.constant 6 : i32
    %2 = arith.muli %arg0, %c6_i32 : i32
    %3 = vector.broadcast %2 : i32 to vector<6x1xi32>
    %4 = arith.addi %3, %1 : vector<6x1xi32>
    %c4_i32 = arith.constant 4 : i32
    %5 = vector.broadcast %c4_i32 : i32 to vector<6x1xi32>
    %6 = arith.muli %4, %5 : vector<6x1xi32>
    %7 = tpu.iota {dimensions = array<i32: 1>} : vector<6x32xi32>
    %cst = arith.constant 0.000000e+00 : f32
    %8 = vector.broadcast %cst : f32 to vector<6x1xf32>
    %cst_1 = arith.constant 0.000000e+00 : f32
    %9 = vector.broadcast %cst_1 : f32 to vector<6x1xf32>
    %c0_2 = arith.constant 0 : index
    %c0_3 = arith.constant 0 : index
    %10 = vector.load %arg1[%c0_2, %c0_3] : memref<6x128xf32, #tpu.memory_space<vmem>>, vector<6x32xf32>
    %11 = vector.extract_strided_slice %0 {offsets = [0, 0], sizes = [6, 1], strides = [1, 1]} : vector<6x4xi32> to vector<6x1xi32>
    %cst_4 = arith.constant dense<0xFF800000> : vector<6xf32>
    %12 = vector.multi_reduction <maximumf>, %10, %cst_4 [1] : vector<6x32xf32> to vector<6xf32>
    %13 = vector.shape_cast %12 : vector<6xf32> to vector<6x1xf32>
    %14 = vector.broadcast %13 : vector<6x1xf32> to vector<6x32xf32>
    %15 = arith.subf %10, %14 : vector<6x32xf32>
    %16 = math.exp %15 : vector<6x32xf32>
    %cst_5 = arith.constant dense<0.000000e+00> : vector<6xf32>
    %17 = vector.multi_reduction <add>, %16, %cst_5 [1] : vector<6x32xf32> to vector<6xf32>
    %18 = vector.shape_cast %17 : vector<6xf32> to vector<6x1xf32>
    %19 = math.log %18 : vector<6x1xf32>
    %20 = vector.broadcast %11 : vector<6x1xi32> to vector<6x32xi32>
    %21 = arith.cmpi eq, %7, %20 : vector<6x32xi32>
    %cst_6 = arith.constant 0.000000e+00 : f32
    %22 = vector.broadcast %cst_6 : f32 to vector<6x32xf32>
    %23 = arith.select %21, %10, %22 : vector<6x32xi1>, vector<6x32xf32>
    %cst_7 = arith.constant dense<0.000000e+00> : vector<6xf32>
    %24 = vector.multi_reduction <add>, %23, %cst_7 [1] : vector<6x32xf32> to vector<6xf32>
    %25 = vector.shape_cast %24 : vector<6xf32> to vector<6x1xf32>
    %26 = arith.subf %25, %13 : vector<6x1xf32>
    %27 = arith.subf %26, %19 : vector<6x1xf32>
    %28 = math.exp %27 : vector<6x1xf32>
    %cst_8 = arith.constant 1.000000e+00 : f32
    %29 = vector.broadcast %cst_8 : f32 to vector<6x1xf32>
    %30 = arith.subf %29, %28 : vector<6x1xf32>
    %cst_9 = arith.constant 1.000000e+00 : f32
    %31 = vector.broadcast %cst_9 : f32 to vector<6x1xf32>
    %32 = arith.mulf %31, %30 : vector<6x1xf32>
    %33 = arith.mulf %32, %30 : vector<6x1xf32>
    %34 = arith.mulf %33, %27 : vector<6x1xf32>
    %c-100_i32 = arith.constant -100 : i32
    %35 = vector.broadcast %c-100_i32 : i32 to vector<6x1xi32>
    %36 = arith.cmpi ne, %11, %35 : vector<6x1xi32>
    %c0_i32 = arith.constant 0 : i32
    %37 = vector.broadcast %c0_i32 : i32 to vector<6x1xi32>
    %38 = arith.addi %6, %37 : vector<6x1xi32>
    %c22_i32 = arith.constant 22 : i32
    %39 = vector.broadcast %c22_i32 : i32 to vector<6x1xi32>
    %40 = arith.cmpi slt, %38, %39 : vector<6x1xi32>
    %41 = arith.andi %36, %40 : vector<6x1xi1>
    %cst_10 = arith.constant 0.000000e+00 : f32
    %42 = vector.broadcast %cst_10 : f32 to vector<6x1xf32>
    %43 = arith.subf %42, %34 : vector<6x1xf32>
    %cst_11 = arith.constant 0.000000e+00 : f32
    %44 = vector.broadcast %cst_11 : f32 to vector<6x1xf32>
    %45 = arith.select %41, %43, %44 : vector<6x1xi1>, vector<6x1xf32>
    %46 = arith.addf %8, %45 : vector<6x1xf32>
    %47 = arith.extui %41 : vector<6x1xi1> to vector<6x1xi32>
    %48 = arith.sitofp %47 : vector<6x1xi32> to vector<6x1xf32>
    %49 = arith.addf %9, %48 : vector<6x1xf32>
    %c0_12 = arith.constant 0 : index
    %c32 = arith.constant 32 : index
    %50 = vector.load %arg1[%c0_12, %c32] : memref<6x128xf32, #tpu.memory_space<vmem>>, vector<6x32xf32>
    %51 = vector.extract_strided_slice %0 {offsets = [0, 1], sizes = [6, 1], strides = [1, 1]} : vector<6x4xi32> to vector<6x1xi32>
    %cst_13 = arith.constant dense<0xFF800000> : vector<6xf32>
    %52 = vector.multi_reduction <maximumf>, %50, %cst_13 [1] : vector<6x32xf32> to vector<6xf32>
    %53 = vector.shape_cast %52 : vector<6xf32> to vector<6x1xf32>
    %54 = vector.broadcast %53 : vector<6x1xf32> to vector<6x32xf32>
    %55 = arith.subf %50, %54 : vector<6x32xf32>
    %56 = math.exp %55 : vector<6x32xf32>
    %cst_14 = arith.constant dense<0.000000e+00> : vector<6xf32>
    %57 = vector.multi_reduction <add>, %56, %cst_14 [1] : vector<6x32xf32> to vector<6xf32>
    %58 = vector.shape_cast %57 : vector<6xf32> to vector<6x1xf32>
    %59 = math.log %58 : vector<6x1xf32>
    %60 = vector.broadcast %51 : vector<6x1xi32> to vector<6x32xi32>
    %61 = arith.cmpi eq, %7, %60 : vector<6x32xi32>
    %cst_15 = arith.constant 0.000000e+00 : f32
    %62 = vector.broadcast %cst_15 : f32 to vector<6x32xf32>
    %63 = arith.select %61, %50, %62 : vector<6x32xi1>, vector<6x32xf32>
    %cst_16 = arith.constant dense<0.000000e+00> : vector<6xf32>
    %64 = vector.multi_reduction <add>, %63, %cst_16 [1] : vector<6x32xf32> to vector<6xf32>
    %65 = vector.shape_cast %64 : vector<6xf32> to vector<6x1xf32>
    %66 = arith.subf %65, %53 : vector<6x1xf32>
    %67 = arith.subf %66, %59 : vector<6x1xf32>
    %68 = math.exp %67 : vector<6x1xf32>
    %cst_17 = arith.constant 1.000000e+00 : f32
    %69 = vector.broadcast %cst_17 : f32 to vector<6x1xf32>
    %70 = arith.subf %69, %68 : vector<6x1xf32>
    %cst_18 = arith.constant 1.000000e+00 : f32
    %71 = vector.broadcast %cst_18 : f32 to vector<6x1xf32>
    %72 = arith.mulf %71, %70 : vector<6x1xf32>
    %73 = arith.mulf %72, %70 : vector<6x1xf32>
    %74 = arith.mulf %73, %67 : vector<6x1xf32>
    %c-100_i32_19 = arith.constant -100 : i32
    %75 = vector.broadcast %c-100_i32_19 : i32 to vector<6x1xi32>
    %76 = arith.cmpi ne, %51, %75 : vector<6x1xi32>
    %c1_i32 = arith.constant 1 : i32
    %77 = vector.broadcast %c1_i32 : i32 to vector<6x1xi32>
    %78 = arith.addi %6, %77 : vector<6x1xi32>
    %c22_i32_20 = arith.constant 22 : i32
    %79 = vector.broadcast %c22_i32_20 : i32 to vector<6x1xi32>
    %80 = arith.cmpi slt, %78, %79 : vector<6x1xi32>
    %81 = arith.andi %76, %80 : vector<6x1xi1>
    %cst_21 = arith.constant 0.000000e+00 : f32
    %82 = vector.broadcast %cst_21 : f32 to vector<6x1xf32>
    %83 = arith.subf %82, %74 : vector<6x1xf32>
    %cst_22 = arith.constant 0.000000e+00 : f32
    %84 = vector.broadcast %cst_22 : f32 to vector<6x1xf32>
    %85 = arith.select %81, %83, %84 : vector<6x1xi1>, vector<6x1xf32>
    %86 = arith.addf %46, %85 : vector<6x1xf32>
    %87 = arith.extui %81 : vector<6x1xi1> to vector<6x1xi32>
    %88 = arith.sitofp %87 : vector<6x1xi32> to vector<6x1xf32>
    %89 = arith.addf %49, %88 : vector<6x1xf32>
    %c0_23 = arith.constant 0 : index
    %c64 = arith.constant 64 : index
    %90 = vector.load %arg1[%c0_23, %c64] : memref<6x128xf32, #tpu.memory_space<vmem>>, vector<6x32xf32>
    %91 = vector.extract_strided_slice %0 {offsets = [0, 2], sizes = [6, 1], strides = [1, 1]} : vector<6x4xi32> to vector<6x1xi32>
    %cst_24 = arith.constant dense<0xFF800000> : vector<6xf32>
    %92 = vector.multi_reduction <maximumf>, %90, %cst_24 [1] : vector<6x32xf32> to vector<6xf32>
    %93 = vector.shape_cast %92 : vector<6xf32> to vector<6x1xf32>
    %94 = vector.broadcast %93 : vector<6x1xf32> to vector<6x32xf32>
    %95 = arith.subf %90, %94 : vector<6x32xf32>
    %96 = math.exp %95 : vector<6x32xf32>
    %cst_25 = arith.constant dense<0.000000e+00> : vector<6xf32>
    %97 = vector.multi_reduction <add>, %96, %cst_25 [1] : vector<6x32xf32> to vector<6xf32>
    %98 = vector.shape_cast %97 : vector<6xf32> to vector<6x1xf32>
    %99 = math.log %98 : vector<6x1xf32>
    %100 = vector.broadcast %91 : vector<6x1xi32> to vector<6x32xi32>
    %101 = arith.cmpi eq, %7, %100 : vector<6x32xi32>
    %cst_26 = arith.constant 0.000000e+00 : f32
    %102 = vector.broadcast %cst_26 : f32 to vector<6x32xf32>
    %103 = arith.select %101, %90, %102 : vector<6x32xi1>, vector<6x32xf32>
    %cst_27 = arith.constant dense<0.000000e+00> : vector<6xf32>
    %104 = vector.multi_reduction <add>, %103, %cst_27 [1] : vector<6x32xf32> to vector<6xf32>
    %105 = vector.shape_cast %104 : vector<6xf32> to vector<6x1xf32>
    %106 = arith.subf %105, %93 : vector<6x1xf32>
    %107 = arith.subf %106, %99 : vector<6x1xf32>
    %108 = math.exp %107 : vector<6x1xf32>
    %cst_28 = arith.constant 1.000000e+00 : f32
    %109 = vector.broadcast %cst_28 : f32 to vector<6x1xf32>
    %110 = arith.subf %109, %108 : vector<6x1xf32>
    %cst_29 = arith.constant 1.000000e+00 : f32
    %111 = vector.broadcast %cst_29 : f32 to vector<6x1xf32>
    %112 = arith.mulf %111, %110 : vector<6x1xf32>
    %113 = arith.mulf %112, %110 : vector<6x1xf32>
    %114 = arith.mulf %113, %107 : vector<6x1xf32>
    %c-100_i32_30 = arith.constant -100 : i32
    %115 = vector.broadcast %c-100_i32_30 : i32 to vector<6x1xi32>
    %116 = arith.cmpi ne, %91, %115 : vector<6x1xi32>
    %c2_i32 = arith.constant 2 : i32
    %117 = vector.broadcast %c2_i32 : i32 to vector<6x1xi32>
    %118 = arith.addi %6, %117 : vector<6x1xi32>
    %c22_i32_31 = arith.constant 22 : i32
    %119 = vector.broadcast %c22_i32_31 : i32 to vector<6x1xi32>
    %120 = arith.cmpi slt, %118, %119 : vector<6x1xi32>
    %121 = arith.andi %116, %120 : vector<6x1xi1>
    %cst_32 = arith.constant 0.000000e+00 : f32
    %122 = vector.broadcast %cst_32 : f32 to vector<6x1xf32>
    %123 = arith.subf %122, %114 : vector<6x1xf32>
    %cst_33 = arith.constant 0.000000e+00 : f32
    %124 = vector.broadcast %cst_33 : f32 to vector<6x1xf32>
    %125 = arith.select %121, %123, %124 : vector<6x1xi1>, vector<6x1xf32>
    %126 = arith.addf %86, %125 : vector<6x1xf32>
    %127 = arith.extui %121 : vector<6x1xi1> to vector<6x1xi32>
    %128 = arith.sitofp %127 : vector<6x1xi32> to vector<6x1xf32>
    %129 = arith.addf %89, %128 : vector<6x1xf32>
    %c0_34 = arith.constant 0 : index
    %c96 = arith.constant 96 : index
    %130 = vector.load %arg1[%c0_34, %c96] : memref<6x128xf32, #tpu.memory_space<vmem>>, vector<6x32xf32>
    %131 = vector.extract_strided_slice %0 {offsets = [0, 3], sizes = [6, 1], strides = [1, 1]} : vector<6x4xi32> to vector<6x1xi32>
    %cst_35 = arith.constant dense<0xFF800000> : vector<6xf32>
    %132 = vector.multi_reduction <maximumf>, %130, %cst_35 [1] : vector<6x32xf32> to vector<6xf32>
    %133 = vector.shape_cast %132 : vector<6xf32> to vector<6x1xf32>
    %134 = vector.broadcast %133 : vector<6x1xf32> to vector<6x32xf32>
    %135 = arith.subf %130, %134 : vector<6x32xf32>
    %136 = math.exp %135 : vector<6x32xf32>
    %cst_36 = arith.constant dense<0.000000e+00> : vector<6xf32>
    %137 = vector.multi_reduction <add>, %136, %cst_36 [1] : vector<6x32xf32> to vector<6xf32>
    %138 = vector.shape_cast %137 : vector<6xf32> to vector<6x1xf32>
    %139 = math.log %138 : vector<6x1xf32>
    %140 = vector.broadcast %131 : vector<6x1xi32> to vector<6x32xi32>
    %141 = arith.cmpi eq, %7, %140 : vector<6x32xi32>
    %cst_37 = arith.constant 0.000000e+00 : f32
    %142 = vector.broadcast %cst_37 : f32 to vector<6x32xf32>
    %143 = arith.select %141, %130, %142 : vector<6x32xi1>, vector<6x32xf32>
    %cst_38 = arith.constant dense<0.000000e+00> : vector<6xf32>
    %144 = vector.multi_reduction <add>, %143, %cst_38 [1] : vector<6x32xf32> to vector<6xf32>
    %145 = vector.shape_cast %144 : vector<6xf32> to vector<6x1xf32>
    %146 = arith.subf %145, %133 : vector<6x1xf32>
    %147 = arith.subf %146, %139 : vector<6x1xf32>
    %148 = math.exp %147 : vector<6x1xf32>
    %cst_39 = arith.constant 1.000000e+00 : f32
    %149 = vector.broadcast %cst_39 : f32 to vector<6x1xf32>
    %150 = arith.subf %149, %148 : vector<6x1xf32>
    %cst_40 = arith.constant 1.000000e+00 : f32
    %151 = vector.broadcast %cst_40 : f32 to vector<6x1xf32>
    %152 = arith.mulf %151, %150 : vector<6x1xf32>
    %153 = arith.mulf %152, %150 : vector<6x1xf32>
    %154 = arith.mulf %153, %147 : vector<6x1xf32>
    %c-100_i32_41 = arith.constant -100 : i32
    %155 = vector.broadcast %c-100_i32_41 : i32 to vector<6x1xi32>
    %156 = arith.cmpi ne, %131, %155 : vector<6x1xi32>
    %c3_i32 = arith.constant 3 : i32
    %157 = vector.broadcast %c3_i32 : i32 to vector<6x1xi32>
    %158 = arith.addi %6, %157 : vector<6x1xi32>
    %c22_i32_42 = arith.constant 22 : i32
    %159 = vector.broadcast %c22_i32_42 : i32 to vector<6x1xi32>
    %160 = arith.cmpi slt, %158, %159 : vector<6x1xi32>
    %161 = arith.andi %156, %160 : vector<6x1xi1>
    %cst_43 = arith.constant 0.000000e+00 : f32
    %162 = vector.broadcast %cst_43 : f32 to vector<6x1xf32>
    %163 = arith.subf %162, %154 : vector<6x1xf32>
    %cst_44 = arith.constant 0.000000e+00 : f32
    %164 = vector.broadcast %cst_44 : f32 to vector<6x1xf32>
    %165 = arith.select %161, %163, %164 : vector<6x1xi1>, vector<6x1xf32>
    %166 = arith.addf %126, %165 : vector<6x1xf32>
    %167 = arith.extui %161 : vector<6x1xi1> to vector<6x1xi32>
    %168 = arith.sitofp %167 : vector<6x1xi32> to vector<6x1xf32>
    %169 = arith.addf %129, %168 : vector<6x1xf32>
    %170 = vector.shape_cast %166 : vector<6x1xf32> to vector<1x6x1xf32>
    %cst_45 = arith.constant dense<0.000000e+00> : vector<1xf32>
    %171 = vector.multi_reduction <add>, %170, %cst_45 [1, 2] : vector<1x6x1xf32> to vector<1xf32>
    %172 = vector.shape_cast %171 : vector<1xf32> to vector<1x1x1xf32>
    %173 = vector.extract %172[0, 0, 0] : f32 from vector<1x1x1xf32>
    %174 = vector.broadcast %173 : f32 to vector<1x8x128xf32>
    %c0_46 = arith.constant 0 : index
    %c0_47 = arith.constant 0 : index
    %c0_48 = arith.constant 0 : index
    %175 = vector.load %arg3[%c0_46, %c0_47, %c0_48] : memref<1x8x128xf32, #tpu.memory_space<vmem>>, vector<1x8x128xf32>
    tpu.vector_store %arg3[%c0_46, %c0_47, %c0_48], %174 {strides = array<i32>} : memref<1x8x128xf32, #tpu.memory_space<vmem>>, vector<1x8x128xf32>,
    %176 = vector.shape_cast %169 : vector<6x1xf32> to vector<1x6x1xf32>
    %cst_49 = arith.constant dense<0.000000e+00> : vector<1xf32>
    %177 = vector.multi_reduction <add>, %176, %cst_49 [1, 2] : vector<1x6x1xf32> to vector<1xf32>
    %178 = vector.shape_cast %177 : vector<1xf32> to vector<1x1x1xf32>
    %179 = vector.extract %178[0, 0, 0] : f32 from vector<1x1x1xf32>
    %180 = vector.broadcast %179 : f32 to vector<1x8x128xf32>
    %c0_50 = arith.constant 0 : index
    %c0_51 = arith.constant 0 : index
    %c0_52 = arith.constant 0 : index
    %181 = vector.load %arg4[%c0_50, %c0_51, %c0_52] : memref<1x8x128xf32, #tpu.memory_space<vmem>>, vector<1x8x128xf32>
    tpu.vector_store %arg4[%c0_50, %c0_51, %c0_52], %180 {strides = array<i32>} : memref<1x8x128xf32, #tpu.memory_space<vmem>>, vector<1x8x128xf32>,
    return
  }
  func.func @transform_0(%arg0: i32) -> (i32, i32) {
    %c0_i32 = arith.constant 0 : i32
    %c0_i32_0 = arith.constant 0 : i32
    return %arg0, %c0_i32 : i32, i32
  }
  func.func @transform_1(%arg0: i32) -> (i32, i32) {
    %c0_i32 = arith.constant 0 : i32
    %c0_i32_0 = arith.constant 0 : i32
    return %arg0, %c0_i32 : i32, i32
  }
  func.func @transform_2(%arg0: i32) -> (i32, i32, i32) {
    %c0_i32 = arith.constant 0 : i32
    %c0_i32_0 = arith.constant 0 : i32
    %c0_i32_1 = arith.constant 0 : i32
    return %arg0, %c0_i32, %c0_i32_0 : i32, i32, i32
  }
  func.func @transform_3(%arg0: i32) -> (i32, i32, i32) {
    %c0_i32 = arith.constant 0 : i32
    %c0_i32_0 = arith.constant 0 : i32
    %c0_i32_1 = arith.constant 0 : i32
    return %arg0, %c0_i32, %c0_i32_0 : i32, i32, i32
  }
}

</mosaic_0001>

<bundles_post_ra>
// kernel: tpu_custom_call.1
= control target key start
LH: loop header
LB: loop body
LE: loop exit
PB: predicated region body
PF: predicated region fallthrough
CT: control target
= control target key end

     0   :  { %9 = vsyncpa [#allocation3], 0  ;;  %vm61_vm0 = vcmask 521472   ;;  %vm113_vm1 = vcmask 783872   ;;  %vm164_vm2 = vcmask 1046272   ;;  %v366_v3 = vmov 2   ;;  %s540_s0 = inlined_call_operand.vmem [shape: f32[6,128], index: 0, kind: input, shape index: {}]   ;;  %s541_s1 = inlined_call_operand.vmem [shape: s32[6,4], index: 1, kind: input, shape index: {}]   ;;  %s542_s2 = inlined_call_operand.hbm [shape: f32[1,8,128], index: 2, kind: output, shape index: {0}]   ;;  %s543_s3 = inlined_call_operand.hbm [shape: f32[1,8,128], index: 3, kind: output, shape index: {1}]  }
   0x1   :  { %v402_v0 = vld [vmem:[%s540_s0] sm:$0x3f]  ;;  %290 = vset.pattern.permute.xlu1 %v366_v3 }
   0x2   :  { %v62_v1 = vsel %vm61_vm0, %v402_v0, -inf  ;;  %v165_v2 = vsel %vm164_vm2, %v402_v0, -inf }
   0x3   :  { %63 = vmax.xlane.f32.xlu0 %v62_v1  ;;  %166 = vmax.xlane.f32.xlu1 %v165_v2 }
   0x4   :  { %10 = vsyncpa [#allocation5], 0  ;;  %v114_v4 = vsel %vm113_vm1, %v402_v0, -inf  ;;  %v367_v5 = vmov 1   ;;  %v410_v6 = vld [vmem:[%s541_s1] sm:$0x3f]  ;;  %v16_v26 = vlaneseq }
   0x5   :  { %289 = vset.pattern.permute.xlu0 %v367_v5  ;;  %v368_v7 = vmov 3   ;;  %s369_s15 = smov 96   ;;  %s370_s1 = smov 64   ;;  %v372_v20 = vmov 0   ;;  %vm25_vm3 = vcmask 259072   ;;  %vm52_vm7 = vcmp.ne.s32.totalorder %v410_v6, 4294967196 }
   0x6   :  { %s371_s16 = smov 32   ;;  %v26_v21 = vsel %vm25_vm3, %v402_v0, -inf  ;;  %v23_v30 = vand.u32 127, %v16_v26  ;;  %v17_v42 = vshrl.u32 %v16_v26, 7  ;;  %v373_v48 = vmov 0.0   ;;  %s374_s17 = smov 127  }
   0x7   :  { %115 = vmax.xlane.f32.xlu0 %v114_v4  ;;  %s375_s18 = smov 126   ;;  %s376_s19 = smov 125   ;;  %vm215_vm1 = vcmask 5120  }
   0x8   :  { %v439_v43 = vmul.u32 4, %v17_v42  ;;  %s377_s20 = smov [#allocation2]   ;;  %s378_s22 = smov [#allocation4]  }
   0x9   :  { %s246_s21 = sshll.u32 %s377_s20, 4  ;;  %s256_s23 = sshll.u32 %s378_s22, 4  ;;  %s247_s21 = int_to_ptr.vmem [resolvable:$true] %s246_s21  ;;  %s509_s23 = int_to_ptr.vmem [resolvable:$true] %s256_s23 }
   0xa   :  { %v96_v44 = vadd.s32 1, %v439_v43  ;;  %v147_v45 = vadd.s32 2, %v439_v43  ;;  %v198_v46 = vadd.s32 3, %v439_v43  ;;  %vm53_vm15 = vcmp.lt.s32.totalorder %v439_v43, 22  ;;  %s318_s26 = scalar_lea.vmem %s247_s21, 128  ;;  %p323_p1 = scmp.lt.s32.totalorder %s247_s21, %s247_s21 }
   0xb   :  { %vm491_vm0 = vmand %vm52_vm7, %vm53_vm15  ;;  %p319_p0 = scmp.ne.s32.totalorder %s247_s21, %s318_s26  ;;  %p324_p2 = scmp.lt.s32.totalorder %s318_s26, %s318_s26 }
   0xc   :  { %vm97_vm8 = vcmp.lt.s32.totalorder %v96_v44, 22  ;;  %vm148_vm9 = vcmp.lt.s32.totalorder %v147_v45, 22  ;;  %vm199_vm12 = vcmp.lt.s32.totalorder %v198_v46, 22 }
   0xd   :  { %vm447_vm10 = vmand %vm52_vm7, %vm97_vm8  ;;  %p325_p3 = por %p324_p2, %p323_p1 }
   0xe   :  { %v269_v49 = vsel %vm447_vm10, 1.0, %v373_v48  ;;  %vm456_vm11 = vmand %vm52_vm7, %vm148_vm9 }
   0xf   :  { %v270_v51 = vsel %vm456_vm11, 1.0, %v373_v48  ;;  %vm466_vm13 = vmand %vm52_vm7, %vm199_vm12  ;;  %p326_p4 = pnand %p325_p3, %p319_p0 }
  0x10   :  { %v271_v53 = vsel %vm466_vm13, 1.0, %v373_v48 }
  0x14   :  { %130 = vperm.xlu1 %290, %v410_v6  }
  0x18   :  { %291 = vset.pattern.permute.xlu1 %v368_v7 }
  0x19   :  { %181 = vperm.xlu1 %291, %v410_v6  }
  0x1d   :  { %78 = vperm.xlu0 %289, %v410_v6   ;;  %82 = vrot.lane.b32.xlu1 %v402_v0, %s369_s15 }
  0x21   :  { %292 = vset.pattern.permute.xlu0 %v372_v20 }
  0x90   :  { %v416_v8 = vpop.xlane.xlu0 %63  ;;  %v418_v9 = vpop.xlane.xlu1 %166 }
  0x91   :  { %v65_v10 = vsub.f32 %v402_v0, %v416_v8  ;;  %v168_v12 = vsub.f32 %v402_v0, %v418_v9 }
  0x93   :  { %v66_v11 = vmul.f32 1.442695, %v65_v10  ;;  %v169_v16 = vmul.f32 1.442695, %v168_v12 }
  0x94   :  { %v424_v13 = vpop.xlane.xlu0 %115  ;;  %v131_v22 = vpop.permute.xlu1 %130 }
  0x95   :  { %294 = vpow2.f32 %v66_v11  ;;  %v117_v14 = vsub.f32 %v402_v0, %v424_v13  ;;  %vm132_vm5 = vcmp.eq.s32.totalorder %v23_v30, %v131_v22 }
  0x97   :  { %v118_v15 = vmul.f32 1.442695, %v117_v14 }
  0x98   :  { %v182_v23 = vpop.permute.xlu1 %181 }
  0x99   :  { %296 = vpow2.f32 %v118_v15  ;;  %vm183_vm6 = vcmp.eq.s32.totalorder %v23_v30, %v182_v23 }
  0x9a   :  { %298 = vpow2.f32 %v169_v16 }
  0x9c   :  { %v83_v24 = vpop.permute.xlu1 %82  ;;  %v79_v28 = vpop.permute.xlu0 %78 }
  0x9d   :  { %vm80_vm4 = vcmp.eq.s32.totalorder %v23_v30, %v79_v28 }
  0x9e   :  { %v85_v34 = vsel %vm80_vm4, %v83_v24, 0.0 }
  0x9f   :  { %v295_v17 = vpop.eup %294  ;;  %v86_v36 = vsel %vm25_vm3, %v85_v34, 0.0 }
  0xa0   :  { %69 = vrot.lane.b32.xlu1 %v295_v17, %s369_s15 }
  0xa3   :  { %v297_v18 = vpop.eup %296 }
  0xa4   :  { %121 = vrot.lane.b32.xlu1 %v297_v18, %s370_s1  ;;  %v299_v19 = vpop.eup %298 }
  0xa8   :  { %172 = vrot.lane.b32.xlu1 %v299_v19, %s371_s16 }
  0xac   :  { %133 = vrot.lane.b32.xlu1 %v402_v0, %s370_s1 }
  0xb0   :  { %184 = vrot.lane.b32.xlu1 %v402_v0, %s371_s16 }
  0xd4   :  { %27 = vmax.xlane.f32.xlu1 %v26_v21 }
 0x112   :  { %v70_v25 = vpop.permute.xlu1 %69 }
 0x113   :  { %v72_v27 = vsel %vm25_vm3, %v70_v25, 0.0 }
 0x114   :  { %73 = vadd.xlane.f32.xlu0 %v72_v27 }
 0x116   :  { %v122_v29 = vpop.permute.xlu1 %121 }
 0x117   :  { %v124_v31 = vsel %vm25_vm3, %v122_v29, 0.0 }
 0x118   :  { %125 = vadd.xlane.f32.xlu1 %v124_v31 }
 0x11a   :  { %v173_v32 = vpop.permute.xlu1 %172 }
 0x11b   :  { %v175_v33 = vsel %vm25_vm3, %v173_v32, 0.0 }
 0x11c   :  { %176 = vadd.xlane.f32.xlu1 %v175_v33 }
 0x11e   :  { %v134_v35 = vpop.permute.xlu1 %133 }
 0x11f   :  { %v136_v37 = vsel %vm132_vm5, %v134_v35, 0.0 }
 0x120   :  { %87 = vadd.xlane.f32.xlu1 %v86_v36  ;;  %v137_v39 = vsel %vm25_vm3, %v136_v37, 0.0  ;;  %v268_v36 = vsel %vm491_vm0, 1.0, %v373_v48 }
 0x122   :  { %v185_v38 = vpop.permute.xlu1 %184 }
 0x123   :  { %v187_v40 = vsel %vm183_vm6, %v185_v38, 0.0 }
 0x124   :  { %138 = vadd.xlane.f32.xlu1 %v137_v39  ;;  %v188_v41 = vsel %vm25_vm3, %v187_v40, 0.0 }
 0x128   :  { %189 = vadd.xlane.f32.xlu1 %v188_v41 }
 0x12a   :  { %38 = vperm.xlu0 %292, %v410_v6  }
 0x12e   :  { %293 = vset.pattern.permute.xlu0 %v368_v7 }
 0x12f   :  { %109 = vrot.lane.b32.xlu0 %v269_v49, %s374_s17 }
 0x133   :  { %160 = vrot.lane.b32.xlu0 %v270_v51, %s375_s18 }
 0x137   :  { %211 = vrot.lane.b32.xlu0 %v271_v53, %s376_s19 }
 0x161   :  { %v475_v54 = vpop.xlane.xlu1 %27 }
 0x162   :  { %v29_v55 = vsub.f32 %v402_v0, %v475_v54 }
 0x164   :  { %v30_v56 = vmul.f32 1.442695, %v29_v55 }
 0x166   :  { %300 = vpow2.f32 %v30_v56 }
 0x170   :  { %v301_v57 = vpop.eup %300 }
 0x171   :  { %v32_v58 = vsel %vm25_vm3, %v301_v57, 0.0 }
 0x172   :  { %33 = vadd.xlane.f32.xlu1 %v32_v58 }
 0x1a1   :  { %v74_v59 = vpop.xlane.xlu0 %73 }
 0x1a2   :  { %302 = vlog2.f32 %v74_v59 }
 0x1a5   :  { %v126_v60 = vpop.xlane.xlu1 %125 }
 0x1a6   :  { %304 = vlog2.f32 %v126_v60 }
 0x1a9   :  { %v177_v61 = vpop.xlane.xlu1 %176  ;;  %v39_v62 = vpop.permute.xlu0 %38 }
 0x1aa   :  { %306 = vlog2.f32 %v177_v61  ;;  %vm40_vm14 = vcmp.eq.s32.totalorder %v23_v30, %v39_v62 }
 0x1ab   :  { %v41_v63 = vsel %vm40_vm14, %v402_v0, 0.0 }
 0x1ac   :  { %v303_v1 = vpop.eup %302  ;;  %v42_v2 = vsel %vm25_vm3, %v41_v63, 0.0 }
 0x1ad   :  { %v76_v3 = vmul.f32 0.6931472, %v303_v1  ;;  %v88_v4 = vpop.xlane.xlu1 %87  ;;  %43 = vadd.xlane.f32.xlu1 %v42_v2  ;;  %v110_v30 = vpop.permute.xlu0 %109 }
 0x1ae   :  { %v89_v5 = vsub.f32 %v88_v4, %v416_v8  ;;  %v112_v40 = vadd.f32 %v268_v36, %v110_v30 }
 0x1b0   :  { %v305_v7 = vpop.eup %304  ;;  %v90_v10 = vsub.f32 %v89_v5, %v76_v3 }
 0x1b1   :  { %v128_v11 = vmul.f32 0.6931472, %v305_v7  ;;  %v139_v12 = vpop.xlane.xlu1 %138  ;;  %v161_v37 = vpop.permute.xlu0 %160 }
 0x1b2   :  { %v91_v14 = vmul.f32 1.442695, %v90_v10  ;;  %v140_v15 = vsub.f32 %v139_v12, %v424_v13  ;;  %v163_v42 = vadd.f32 %v161_v37, %v112_v40 }
 0x1b4   :  { %v307_v16 = vpop.eup %306  ;;  %308 = vpow2.f32 %v91_v14  ;;  %v141_v17 = vsub.f32 %v140_v15, %v128_v11 }
 0x1b5   :  { %v179_v18 = vmul.f32 0.6931472, %v307_v16  ;;  %v190_v0 = vpop.xlane.xlu1 %189  ;;  %v212_v43 = vpop.permute.xlu0 %211 }
 0x1b6   :  { %v142_v19 = vmul.f32 1.442695, %v141_v17  ;;  %v191_v20 = vsub.f32 %v190_v0, %v418_v9  ;;  %v214_v44 = vadd.f32 %v212_v43, %v163_v42 }
 0x1b8   :  { %310 = vpow2.f32 %v142_v19  ;;  %v192_v21 = vsub.f32 %v191_v20, %v179_v18  ;;  %v228_v45 = vsel %vm215_vm1, %v214_v44, 0.0 }
 0x1b9   :  { %229 = vadd.xlane.f32.xlu0 %v228_v45 }
 0x1ba   :  { %v193_v22 = vmul.f32 1.442695, %v192_v21 }
 0x1bc   :  { %312 = vpow2.f32 %v193_v22 }
 0x1be   :  { %v309_v8 = vpop.eup %308 }
 0x1bf   :  { %v93_v23 = vsub.f32 1.0, %v309_v8 }
 0x1c1   :  { %v94_v24 = vmul.f32 %v93_v23, %v93_v23 }
 0x1c2   :  { %v311_v25 = vpop.eup %310 }
 0x1c3   :  { %v95_v26 = vmul.f32 %v94_v24, %v90_v10  ;;  %v144_v27 = vsub.f32 1.0, %v311_v25 }
 0x1c5   :  { %v99_v28 = vsub.f32 0.0, %v95_v26  ;;  %v145_v13 = vmul.f32 %v144_v27, %v144_v27 }
 0x1c6   :  { %v313_v29 = vpop.eup %312 }
 0x1c7   :  { %v100_v31 = vsel %vm447_vm10, %v99_v28, 0.0  ;;  %v146_v32 = vmul.f32 %v145_v13, %v141_v17  ;;  %v195_v33 = vsub.f32 1.0, %v313_v29 }
 0x1c8   :  { %102 = vrot.lane.b32.xlu1 %v100_v31, %s374_s17 }
 0x1c9   :  { %v150_v9 = vsub.f32 0.0, %v146_v32  ;;  %v196_v34 = vmul.f32 %v195_v33, %v195_v33 }
 0x1cb   :  { %v151_v38 = vsel %vm456_vm11, %v150_v9, 0.0  ;;  %v197_v39 = vmul.f32 %v196_v34, %v192_v21 }
 0x1cc   :  { %153 = vrot.lane.b32.xlu1 %v151_v38, %s375_s18 }
 0x1cd   :  { %v201_v41 = vsub.f32 0.0, %v197_v39 }
 0x1cf   :  { %v202_v6 = vsel %vm466_vm13, %v201_v41, 0.0 }
 0x1d0   :  { %204 = vrot.lane.b32.xlu1 %v202_v6, %s376_s19 }
 0x1ff   :  { %v34_v46 = vpop.xlane.xlu1 %33 }
 0x200   :  { %314 = vlog2.f32 %v34_v46 }
 0x20a   :  { %v315_v47 = vpop.eup %314 }
 0x20b   :  { %v36_v48 = vmul.f32 0.6931472, %v315_v47 }
 0x23a   :  { %v44_v49 = vpop.xlane.xlu1 %43 }
 0x23b   :  { %v45_v50 = vsub.f32 %v44_v49, %v475_v54 }
 0x23d   :  { %v46_v51 = vsub.f32 %v45_v50, %v36_v48 }
 0x23e   :  { %v103_v56 = vpop.permute.xlu1 %102 }
 0x23f   :  { %v47_v53 = vmul.f32 1.442695, %v46_v51 }
 0x241   :  { %316 = vpow2.f32 %v47_v53 }
 0x242   :  { %v154_v60 = vpop.permute.xlu1 %153 }
 0x246   :  { %v205_v1 = vpop.permute.xlu1 %204  ;;  %v230_v54 = vpop.xlane.xlu0 %229 }
 0x247   :  { %v231_v4 = vrot.slane %v230_v54, 4 }
 0x249   :  { %v232_v5 = vadd.f32 %v231_v4, %v230_v54 }
 0x24b   :  { %v317_v55 = vpop.eup %316  ;;  %v233_v7 = vrot.slane %v232_v5, 2 }
 0x24c   :  { %v49_v52 = vsub.f32 1.0, %v317_v55 }
 0x24d   :  { %v234_v14 = vadd.f32 %v233_v7, %v232_v5 }
 0x24e   :  { %v50_v57 = vmul.f32 %v49_v52, %v49_v52 }
 0x24f   :  { %v235_v17 = vrot.slane %v234_v14, 1 }
 0x250   :  { %v51_v58 = vmul.f32 %v50_v57, %v46_v51 }
 0x251   :  { %v236_v19 = vadd.f32 %v235_v17, %v234_v14 }
 0x252   :  { %v55_v59 = vsub.f32 0.0, %v51_v58 }
 0x254   :  { %v56_v61 = vsel %vm491_vm0, %v55_v59, 0.0 }
 0x255   :  { %v105_v62 = vadd.f32 %v103_v56, %v56_v61 }
 0x257   :  { %v156_v63 = vadd.f32 %v154_v60, %v105_v62 }
 0x259   :  { %v207_v2 = vadd.f32 %v205_v1, %v156_v63 }
 0x25b   :  { %v216_v3 = vsel %vm215_vm1, %v207_v2, 0.0 }
 0x25c   :  { %217 = vadd.xlane.f32.xlu1 %v216_v3 }
 0x2e9   :  { %v218_v10 = vpop.xlane.xlu1 %217 }
 0x2ea   :  { %v219_v11 = vrot.slane %v218_v10, 4 }
 0x2ec   :  { %v220_v12 = vadd.f32 %v219_v11, %v218_v10 }
 0x2ee   :  { %v221_v15 = vrot.slane %v220_v12, 2 }
 0x2f0   :  { %v222_v16 = vadd.f32 %v221_v15, %v220_v12 }
 0x2f2   :  { %v223_v18 = vrot.slane %v222_v16, 1 }
 0x2f4   :  { %v224_v0 = vadd.f32 %v223_v18, %v222_v16 }
 0x2f6   :  { %272 = vpush %v224_v0 }
 0x2f7   :  { %274 = vpush %v236_v19 }
 0x327   :  { %s273_s24 = spop %272 }
 0x328   :  { %v226_v20 = vstv %s273_s24  ;;  %s275_s25 = spop %274 }
 0x329   :  { %227 = vst [vmem:[#allocation2] sm:$0xff] %v226_v20  ;;  %v238_v21 = vstv %s275_s25 }
 0x32a   :  { %239 = vst [vmem:[#allocation4] sm:$0xff] %v238_v21 }
 0x32b   :  { %329 = shalt.err (!%p326_p4)
}
 0x32c   :  { %s330_s29 = scalar_lea.hbm %s542_s2, 128 }
 0x32d   :  { %p331_p5 = scmp.ne.s32.totalorder %s542_s2, %s330_s29  ;;  %p334_p6 = scmp.lt.u32.totalorder %s330_s29, %s542_s2 }
 0x32f   :  { %p336_p7 = pnand %p334_p6, %p331_p5 }
 0x331   :  { %339 = shalt.err (!%p336_p7)
}
 0x332   :  { %249 = dma.vmem_to_hbm [thread:$0]  %s247_s21, 128, %s542_s2, [#allocation3]  }
 0x333   :  { %s340_s9 = scalar_lea.vmem %s509_s23, 128  ;;  %p345_p9 = scmp.lt.s32.totalorder %s509_s23, %s509_s23 }
 0x334   :  { %p341_p8 = scmp.ne.s32.totalorder %s509_s23, %s340_s9  ;;  %p346_p10 = scmp.lt.s32.totalorder %s340_s9, %s340_s9 }
 0x336   :  { %p347_p11 = por %p346_p10, %p345_p9 }
 0x338   :  { %p348_p12 = pnand %p347_p11, %p341_p8 }
 0x33a   :  { %351 = shalt.err (!%p348_p12)
}
 0x33b   :  { %s352_s12 = scalar_lea.hbm %s543_s3, 128 }
 0x33c   :  { %p353_p13 = scmp.ne.s32.totalorder %s543_s3, %s352_s12  ;;  %p356_p0 = scmp.lt.u32.totalorder %s352_s12, %s543_s3 }
 0x33e   :  { %p358_p1 = pnand %p356_p0, %p353_p13 }
 0x340   :  { %361 = shalt.err (!%p358_p1)
}
 0x341   :  { %259 = dma.vmem_to_hbm [thread:$0]  %s509_s23, 128, %s543_s3, [#allocation5]  }
 0x342   :  { %362 = dma.done.wait [#allocation3], 128  }
 0x343   :  { %363 = vsyncadd [#allocation3], 4294967168 }
 0x344   :  { %364 = dma.done.wait [#allocation5], 128  }
 0x345   :  { %365 = vsyncadd [#allocation5], 4294967168 }
 0x346   :  { %266 = vsyncpa [#allocation3], 1 }
 0x347   :  { %267 = vsyncpa [#allocation5], 1 }

</bundles_post_ra>
